<compile_context>
chip_gen: v5e
topology: v5e:2x2
jax: 0.10.0
libtpu: 0.0.40
codegen_flags: <defaults>
</compile_context>

<pallas_src>
import jax
import jax.numpy as jnp
from jax.experimental import pallas as pl
from jax.experimental.pallas import tpu as pltpu

_LANE = 128


def _cdiv(a, b):
    return (a + b - 1) // b


def _round_up(v, m):
    return ((v + m - 1) // m) * m


def _dice_kernel(x_ref, t_ref, out_ref, acc_ref):
    """Accumulate partial sums of sigmoid(x)*t, sigmoid(x), t into (3,8,128)."""
    j = pl.program_id(1)

    @pl.when(j == 0)
    def _():
        acc_ref[...] = jnp.zeros_like(acc_ref)

    x = x_ref[...].astype(jnp.float32)       # (tile_rows, 128)
    t = t_ref[...].astype(jnp.float32)
    s = jax.nn.sigmoid(x)                    # sigmoid(-1e30 pad) == 0 exactly

    tr = x.shape[0]

    # Fold (tile_rows, 128) -> (8, 128): reshape keeps the lane dim and splits
    # the sublane dim, so the sum over axis 0 is pure vreg+vreg on the VPU
    # (no XLU work in the hot loop).
    def fold(v):
        return jnp.sum(v.reshape(tr // 8, 8, _LANE), axis=0)

    acc_ref[0] += fold(s * t)   # intersection partial
    acc_ref[1] += fold(s)       # sum(sigmoid(x)) partial
    acc_ref[2] += fold(t)       # sum(t) partial

    @pl.when(j == pl.num_programs(1) - 1)
    def _():
        out_ref[0] = acc_ref[...]


def dice_loss(inputs, targets, smooth=1.0, tile_rows=1024, n_split=2):
    """Pallas implementation of DiceLoss.forward (returns a f32 scalar)."""
    n = inputs.size
    x = jnp.reshape(inputs, (-1,))
    t = jnp.reshape(targets, (-1,))

    rows_needed = _cdiv(n, _LANE)

    # Tile rows: multiple of 16 (bf16-friendly), clamped so tiny inputs don't
    # pad to a full 1024-row tile. 1024 rows f32 = 512 KiB per input block;
    # 2 inputs x 2 pipeline buffers = 2 MiB, well under every chip's default
    # scoped-VMEM limit (16 MiB on v5e).
    tile_rows = min(tile_rows, _round_up(_cdiv(rows_needed, n_split), 16))
    tile_rows = max(16, _round_up(tile_rows, 16))

    rows = _round_up(rows_needed, n_split * tile_rows)
    pad = rows * _LANE - n
    if pad:
        # sigmoid(-1e30) is exactly 0.0 in f32, so padded logits contribute
        # nothing to any of the three sums; padded targets are 0.
        x = jnp.pad(x, (0, pad), constant_values=-1e30)
        t = jnp.pad(t, (0, pad), constant_values=0)

    x2 = x.reshape(rows, _LANE)
    t2 = t.reshape(rows, _LANE)

    steps = rows // (n_split * tile_rows)
    grid = (n_split, steps)

    def in_map(i, j):
        return (i * steps + j, 0)

    partials = pl.pallas_call(
        _dice_kernel,
        out_shape=jax.ShapeDtypeStruct((n_split, 3, 8, _LANE), jnp.float32),
        grid_spec=pltpu.PrefetchScalarGridSpec(
            num_scalar_prefetch=0,
            grid=grid,
            in_specs=[
                pl.BlockSpec((tile_rows, _LANE), in_map),
                pl.BlockSpec((tile_rows, _LANE), in_map),
            ],
            out_specs=pl.BlockSpec((1, 3, 8, _LANE), lambda i, j: (i, 0, 0, 0)),
            scratch_shapes=[pltpu.VMEM((3, 8, _LANE), jnp.float32)],
        ),
        compiler_params=pltpu.CompilerParams(
            dimension_semantics=("parallel", "arbitrary")),
    )(x2, t2)

    # Single cross-lane/sublane reduction + final dice math (tiny, done by XLA).
    sums = jnp.sum(partials, axis=(0, 2, 3))        # (3,)
    intersection, s_sum, t_sum = sums[0], sums[1], sums[2]
    dice = (2.0 * intersection + smooth) / (s_sum + t_sum + smooth)
    return (1.0 - dice).astype(jnp.float32)


def _dice_loss_ref(inputs, targets, smooth=1.0):
    s = jax.nn.sigmoid(inputs.astype(jnp.float32)).reshape(-1)
    t = targets.astype(jnp.float32).reshape(-1)
    inter = jnp.sum(s * t)
    dice = (2.0 * inter + smooth) / (jnp.sum(s) + jnp.sum(t) + smooth)
    return 1.0 - dice


if __name__ == "__main__":
    key = jax.random.PRNGKey(0)
    k1, k2, k3, k4 = jax.random.split(key, 4)

    # NCHW, like the PyTorch module's typical segmentation inputs.
    x = jax.random.normal(k1, (2, 4, 16, 16), dtype=jnp.float32)
    tgt = jax.random.bernoulli(k2, p=0.5, shape=(2, 4, 16, 16)).astype(jnp.float32)

    loss = jax.block_until_ready(dice_loss(x, tgt, smooth=1.0))
    ref = _dice_loss_ref(x, tgt, smooth=1.0)
    assert jnp.allclose(loss, ref, rtol=1e-5, atol=1e-5), (loss, ref)

    # Shape whose element count is not a multiple of 128 -> exercises the
    # -1e30 / 0 padding path.
    x_odd = jax.random.normal(k3, (2, 3, 17, 19), dtype=jnp.float32)
    t_odd = jax.random.bernoulli(k4, p=0.3, shape=(2, 3, 17, 19)).astype(jnp.float32)

    loss_odd = jax.block_until_ready(dice_loss(x_odd, t_odd, smooth=1.0))
    ref_odd = _dice_loss_ref(x_odd, t_odd, smooth=1.0)
    assert jnp.allclose(loss_odd, ref_odd, rtol=1e-5, atol=1e-5), (loss_odd, ref_odd)

    print("KERNEL_OK")
</pallas_src>

<mosaic_0001>
module attributes {stable_mosaic.version = 11 : i64} {
  func.func @_dice_kernel(%arg0: i32, %arg1: i32, %arg2: memref<16x128xf32, #tpu.memory_space<vmem>>, %arg3: memref<16x128xf32, #tpu.memory_space<vmem>>, %arg4: memref<1x3x8x128xf32, #tpu.memory_space<vmem>>, %arg5: memref<3x8x128xf32, #tpu.memory_space<vmem>>) attributes {dimension_semantics = [#tpu.dimension_semantics<parallel>, #tpu.dimension_semantics<arbitrary>], iteration_bounds = array<i64: 2, 1>, scalar_prefetch = 0 : i64, scratch_operands = 1 : i64, tpu.core_type = #tpu.core_type<tc>, window_params = [{transform_indices = @transform_0, window_bounds = array<i64: 16, 128>}, {transform_indices = @transform_1, window_bounds = array<i64: 16, 128>}, {transform_indices = @transform_2, window_bounds = array<i64: 1, 3, 8, 128>}]} {
    %c0_i32 = arith.constant 0 : i32
    %0 = arith.cmpi eq, %arg1, %c0_i32 : i32
    %1 = arith.extui %0 : i1 to i32
    %c0_i32_0 = arith.constant 0 : i32
    %2 = arith.cmpi ne, %1, %c0_i32_0 : i32
    scf.if %2 {
      %cst_25 = arith.constant 0.000000e+00 : f32
      %38 = vector.broadcast %cst_25 : f32 to vector<3x8x128xf32>
      %c0_26 = arith.constant 0 : index
      %c0_27 = arith.constant 0 : index
      %c0_28 = arith.constant 0 : index
      %39 = vector.load %arg5[%c0_26, %c0_27, %c0_28] : memref<3x8x128xf32, #tpu.memory_space<vmem>>, vector<3x8x128xf32>
      tpu.vector_store %arg5[%c0_26, %c0_27, %c0_28], %38 {strides = array<i32>} : memref<3x8x128xf32, #tpu.memory_space<vmem>>, vector<3x8x128xf32>,
    } else {
    }
    %c0 = arith.constant 0 : index
    %c0_1 = arith.constant 0 : index
    %3 = vector.load %arg2[%c0, %c0_1] : memref<16x128xf32, #tpu.memory_space<vmem>>, vector<16x128xf32>
    %c0_2 = arith.constant 0 : index
    %c0_3 = arith.constant 0 : index
    %4 = vector.load %arg3[%c0_2, %c0_3] : memref<16x128xf32, #tpu.memory_space<vmem>>, vector<16x128xf32>
    %5 = arith.negf %3 : vector<16x128xf32>
    %6 = math.exp %5 : vector<16x128xf32>
    %cst = arith.constant 1.000000e+00 : f32
    %7 = vector.broadcast %cst : f32 to vector<16x128xf32>
    %8 = arith.addf %7, %6 : vector<16x128xf32>
    %9 = arith.divf %7, %8 : vector<16x128xf32>
    %c0_4 = arith.constant 0 : index
    %c0_5 = arith.constant 0 : index
    %c0_6 = arith.constant 0 : index
    %10 = vector.load %arg5[%c0_4, %c0_5, %c0_6] : memref<3x8x128xf32, #tpu.memory_space<vmem>>, vector<1x8x128xf32>
    %11 = vector.shape_cast %10 : vector<1x8x128xf32> to vector<8x128xf32>
    %12 = arith.mulf %9, %4 : vector<16x128xf32>
    %13 = vector.shape_cast %12 : vector<16x128xf32> to vector<2x8x128xf32>
    %cst_7 = arith.constant dense<0.000000e+00> : vector<8x128xf32>
    %14 = vector.multi_reduction <add>, %13, %cst_7 [0] : vector<2x8x128xf32> to vector<8x128xf32>
    %15 = arith.addf %11, %14 : vector<8x128xf32>
    %c0_8 = arith.constant 0 : index
    %c0_9 = arith.constant 0 : index
    %c0_10 = arith.constant 0 : index
    %16 = vector.load %arg5[%c0_8, %c0_9, %c0_10] : memref<3x8x128xf32, #tpu.memory_space<vmem>>, vector<1x8x128xf32>
    %17 = vector.shape_cast %16 : vector<1x8x128xf32> to vector<8x128xf32>
    %18 = vector.shape_cast %15 : vector<8x128xf32> to vector<1x8x128xf32>
    tpu.vector_store %arg5[%c0_8, %c0_9, %c0_10], %18 {strides = array<i32>} : memref<3x8x128xf32, #tpu.memory_space<vmem>>, vector<1x8x128xf32>,
    %c1 = arith.constant 1 : index
    %c0_11 = arith.constant 0 : index
    %c0_12 = arith.constant 0 : index
    %19 = vector.load %arg5[%c1, %c0_11, %c0_12] : memref<3x8x128xf32, #tpu.memory_space<vmem>>, vector<1x8x128xf32>
    %20 = vector.shape_cast %19 : vector<1x8x128xf32> to vector<8x128xf32>
    %21 = vector.shape_cast %9 : vector<16x128xf32> to vector<2x8x128xf32>
    %cst_13 = arith.constant dense<0.000000e+00> : vector<8x128xf32>
    %22 = vector.multi_reduction <add>, %21, %cst_13 [0] : vector<2x8x128xf32> to vector<8x128xf32>
    %23 = arith.addf %20, %22 : vector<8x128xf32>
    %c1_14 = arith.constant 1 : index
    %c0_15 = arith.constant 0 : index
    %c0_16 = arith.constant 0 : index
    %24 = vector.load %arg5[%c1_14, %c0_15, %c0_16] : memref<3x8x128xf32, #tpu.memory_space<vmem>>, vector<1x8x128xf32>
    %25 = vector.shape_cast %24 : vector<1x8x128xf32> to vector<8x128xf32>
    %26 = vector.shape_cast %23 : vector<8x128xf32> to vector<1x8x128xf32>
    tpu.vector_store %arg5[%c1_14, %c0_15, %c0_16], %26 {strides = array<i32>} : memref<3x8x128xf32, #tpu.memory_space<vmem>>, vector<1x8x128xf32>,
    %c2 = arith.constant 2 : index
    %c0_17 = arith.constant 0 : index
    %c0_18 = arith.constant 0 : index
    %27 = vector.load %arg5[%c2, %c0_17, %c0_18] : memref<3x8x128xf32, #tpu.memory_space<vmem>>, vector<1x8x128xf32>
    %28 = vector.shape_cast %27 : vector<1x8x128xf32> to vector<8x128xf32>
    %29 = vector.shape_cast %4 : vector<16x128xf32> to vector<2x8x128xf32>
    %cst_19 = arith.constant dense<0.000000e+00> : vector<8x128xf32>
    %30 = vector.multi_reduction <add>, %29, %cst_19 [0] : vector<2x8x128xf32> to vector<8x128xf32>
    %31 = arith.addf %28, %30 : vector<8x128xf32>
    %c2_20 = arith.constant 2 : index
    %c0_21 = arith.constant 0 : index
    %c0_22 = arith.constant 0 : index
    %32 = vector.load %arg5[%c2_20, %c0_21, %c0_22] : memref<3x8x128xf32, #tpu.memory_space<vmem>>, vector<1x8x128xf32>
    %33 = vector.shape_cast %32 : vector<1x8x128xf32> to vector<8x128xf32>
    %34 = vector.shape_cast %31 : vector<8x128xf32> to vector<1x8x128xf32>
    tpu.vector_store %arg5[%c2_20, %c0_21, %c0_22], %34 {strides = array<i32>} : memref<3x8x128xf32, #tpu.memory_space<vmem>>, vector<1x8x128xf32>,
    %c0_i32_23 = arith.constant 0 : i32
    %35 = arith.cmpi eq, %arg1, %c0_i32_23 : i32
    %36 = arith.extui %35 : i1 to i32
    %c0_i32_24 = arith.constant 0 : i32
    %37 = arith.cmpi ne, %36, %c0_i32_24 : i32
    scf.if %37 {
      %c0_25 = arith.constant 0 : index
      %c0_26 = arith.constant 0 : index
      %c0_27 = arith.constant 0 : index
      %38 = vector.load %arg5[%c0_25, %c0_26, %c0_27] : memref<3x8x128xf32, #tpu.memory_space<vmem>>, vector<3x8x128xf32>
      %c0_28 = arith.constant 0 : index
      %c0_29 = arith.constant 0 : index
      %c0_30 = arith.constant 0 : index
      %c0_31 = arith.constant 0 : index
      %39 = vector.load %arg4[%c0_28, %c0_29, %c0_30, %c0_31] : memref<1x3x8x128xf32, #tpu.memory_space<vmem>>, vector<1x3x8x128xf32>
      %40 = vector.shape_cast %39 : vector<1x3x8x128xf32> to vector<3x8x128xf32>
      %41 = vector.shape_cast %38 : vector<3x8x128xf32> to vector<1x3x8x128xf32>
      tpu.vector_store %arg4[%c0_28, %c0_29, %c0_30, %c0_31], %41 {strides = array<i32>} : memref<1x3x8x128xf32, #tpu.memory_space<vmem>>, vector<1x3x8x128xf32>,
    } else {
    }
    return
  }
  func.func @transform_0(%arg0: i32, %arg1: i32) -> (i32, i32) {
    %c1_i32 = arith.constant 1 : i32
    %0 = arith.muli %arg0, %c1_i32 : i32
    %1 = arith.addi %0, %arg1 : i32
    %c0_i32 = arith.constant 0 : i32
    %c0_i32_0 = arith.constant 0 : i32
    return %1, %c0_i32 : i32, i32
  }
  func.func @transform_1(%arg0: i32, %arg1: i32) -> (i32, i32) {
    %c1_i32 = arith.constant 1 : i32
    %0 = arith.muli %arg0, %c1_i32 : i32
    %1 = arith.addi %0, %arg1 : i32
    %c0_i32 = arith.constant 0 : i32
    %c0_i32_0 = arith.constant 0 : i32
    return %1, %c0_i32 : i32, i32
  }
  func.func @transform_2(%arg0: i32, %arg1: i32) -> (i32, i32, i32, i32) {
    %c0_i32 = arith.constant 0 : i32
    %c0_i32_0 = arith.constant 0 : i32
    %c0_i32_1 = arith.constant 0 : i32
    %c0_i32_2 = arith.constant 0 : i32
    return %arg0, %c0_i32, %c0_i32_0, %c0_i32_1 : i32, i32, i32, i32
  }
}

</mosaic_0001>

<bundles_post_ra>
// kernel: tpu_custom_call.1
= control target key start
LH: loop header
LB: loop body
LE: loop exit
PB: predicated region body
PF: predicated region fallthrough
CT: control target
= control target key end

     0   :  { %7 = vsyncpa [#allocation4], 0  ;;  %s840_s0 = inlined_call_operand.hbm [shape: f32[32,128], index: 0, kind: input, shape index: {}]   ;;  %s841_s1 = inlined_call_operand.hbm [shape: f32[32,128], index: 1, kind: input, shape index: {}]   ;;  %s842_s2 = inlined_call_operand.hbm [shape: f32[2,3,8,128], index: 2, kind: output, shape index: {}]  }
   0x1   :  { %9 = vsyncpa [#allocation4 + $0x1], 0 }
   0x2   :  { %10 = vsyncpa [#allocation7], 0 }
   0x3   :  { %12 = vsyncpa [#allocation7 + $0x1], 0 }
   0x4   :  { %13 = vsyncpa [#allocation5], 0 }
   0x5   :  { %15 = vsyncpa [#allocation5 + $0x1], 0  ;;  %s692_s9 = smov 0   ;;  %s694_s10 = smov 0  }
   0x6   :  { %s696_s11 = smov 0   ;;  %s698_s12 = smov 0  }
   0x7   :  { %s700_s13 = smov 0   ;;  %s702_s14 = smov 0  }
   0x8 LB: > { %s424_s15 = sadd.s32 4294967295, %s671_s14   ;;  %s425_s16 = sadd.s32 4294967294, %s671_s14   ;;  %s671_s14 = sphi %s702_s14, %s21_s14   ;;  %s667_s13 = sphi %s700_s13, %s852_s13   ;;  %s663_s12 = sphi %s698_s12, %s851_s12   ;;  %s659_s11 = sphi %s696_s11, %s850_s11   ;;  %s655_s10 = sphi %s694_s10, %s849_s10   ;;  %s651_s9 = sphi %s692_s9, %s848_s9  }
   0x9   : > { %s33_s17 = sadd.s32 1, %s667_s13  ;;  %s42_s18 = sadd.s32 1, %s659_s11 }
   0xa   : > { %p35_p0 = scmp.ge.s32.totalorder %s33_s17, 2  ;;  %p49_p1 = scmp.ne.s32.totalorder %s659_s11, %s655_s10 }
   0xb   : > { %p50_p2 = scmp.eq.s32.totalorder %s671_s14, 0  ;;  %p55_p3 = scmp.ne.s32.totalorder %s655_s10, %s651_s9 }
   0xc   : > { %s854_s17 = smov (%p35_p0, %s33_s17), 0  ;;  %p56_p5 = scmp.eq.s32.totalorder %s424_s15, 0 }
   0xd   : > { %p733_p4 = por %p50_p2, %p49_p1  ;;  %s39_s20 = ssub.s32 %s667_s13, %s854_s17 }
   0xe   : > { %p107_p6 = scmp.eq.s32.totalorder %s424_s15, 1  ;;  %p40_p7 = scmp.eq.s32.totalorder %s39_s20, 0 }
   0xf   : > { %p739_p8 = por %p56_p5, %p55_p3  ;;  %p113_p10 = scmp.eq.s32.totalorder %s425_s16, 1 }
  0x10   : > { %p743_p9 = por %p107_p6, %p49_p1  ;;  %p427_p12 = scmp.ge.s32.totalorder %s671_s14, 2 }
  0x11   : > { %s748_s23 = scalar_select %p40_p7, %s659_s11, %s42_s18  }
  0x12   : > { %p750_p11 = por %p113_p10, %p55_p3  ;;  %p463_p13 = scmp.lt.s32.totalorder %s671_s14, 2 }
  0x13   : > { %s757_s25 = sand.u32 1, %s659_s11   ;;  %s442_s27 = sshll.u32 %s667_s13, 4 }
  0x14   : > { %s428_s26 = sshll.u32 %s757_s25, 4  ;;  %s143_s30 = scalar_lea.hbm %s840_s0, %s442_s27 }
  0x15   : > { %s137_s3 = scalar_lea.vmem [#allocation3], %s428_s26  ;;  %s144_s5 = sshll.u32 %s143_s30, 4  ;;  %s145_s5 = int_to_ptr.hbm [resolvable:$true] %s144_s5 }
  0x16   : > { %s146_s4 = sshll.u32 %s137_s3, 4  ;;  %p766_p0 = pnand %p463_p13, %p733_p4  ;;  %s147_s4 = int_to_ptr.vmem [resolvable:$true] %s146_s4 }
  0x17   : > { %p434_p1 = scmp.ge.s32.totalorder %s671_s14, 1  ;;  %s134_s7 = scalar_lea.sflag [#allocation4], %s757_s25 }
  0x18   : > { %s673_s8 = smov 128   ;;  %s674_s15 = smov 8  }
  0x19   : > { %455 = dma.hbm_to_vmem [thread:$0]  (!%p766_p0), %s145_s5, 256, %s147_s4, %s134_s7, %s673_s8, %s673_s8, %s674_s15  }
  0x1a   : > { %p177_p2 = scmp.lt.s32.totalorder %s671_s14, 3  ;;  %s166_s20 = scalar_lea.hbm %s841_s1, %s442_s27 }
  0x1b   : > { %s167_s28 = sshll.u32 %s166_s20, 4  ;;  %s160_s19 = scalar_lea.vmem [#allocation6], %s428_s26  ;;  %s168_s28 = int_to_ptr.hbm [resolvable:$true] %s167_s28 }
  0x1c   : > { %p178_p3 = pnand %p434_p1, %p177_p2  ;;  %s169_s29 = sshll.u32 %s160_s19, 4  ;;  %s170_s29 = int_to_ptr.vmem [resolvable:$true] %s169_s29 }
  0x1d   : > { %s157_s30 = scalar_lea.sflag [#allocation7], %s757_s25  ;;  %s782_s3 = sand.u32 (!%p178_p3), 1, %s655_s10  }
  0x1e   : > { %458 = dma.hbm_to_vmem [thread:$0]  (!%p766_p0), %s168_s28, 256, %s170_s29, %s157_s30, %s673_s8, %s673_s8, %s674_s15  }
  0x1f   : > { %181 = sbr.rel (%p178_p3) target bundleno = 77 (0x4d), region = 28  ;;  %s435_s4 = sshll.u32 (!%p178_p3), %s782_s3, 4 }
  0x20   : > { %s184_s5 = scalar_lea.sflag (!%p178_p3), [#allocation4], %s782_s3  ;;  %s187_s7 = scalar_lea.vmem (!%p178_p3), [#allocation3], %s435_s4 }
  0x24   : > { %638 = dma.done.wait (%p739_p8), %s184_s5, 256  }
  0x25   : > { %640 = vsyncadd (%p739_p8), %s184_s5, 4294967040  ;;  %s194_s25 = scalar_lea.sflag [#allocation7], %s782_s3  ;;  %s197_s26 = scalar_lea.vmem [#allocation6], %s435_s4 }
  0x26   : > { %642 = dma.done.wait (%p739_p8), %s194_s25, 256  }
  0x27   : > { %644 = vsyncadd (%p739_p8), %s194_s25, 4294967040  ;;  %s444_s27 = smul.u32 24, %s782_s3  ;;  %v235_v0 = vld [vmem:[%s187_s7] sm:$0xff]  ;;  %v236_v1 = vld [vmem:[%s187_s7 + $0x8] sm:$0xff]  ;;  %s303_s20 = scalar_lea.sflag [#allocation5], %s782_s3 }
  0x28   : > { %v237_v2 = vld [vmem:[%s197_s26] sm:$0xff]  ;;  %v238_v3 = vld [vmem:[%s197_s26 + $0x8] sm:$0xff]  ;;  %v437_v4 = vmul.f32 -1.442695, %v235_v0  ;;  %v438_v5 = vmul.f32 -1.442695, %v236_v1 }
  0x29   : > { %v290_v6 = vadd.f32 %v238_v3, %v237_v2  ;;  %s796_s6 = scalar_lea.vmem [#allocation8], %s444_s27  ;;  %s445_s21 = smul.u32 24, %s663_s12 }
  0x2a   : > { %517 = vpow2.f32 %v437_v4  ;;  %s315_s12 = sshll.u32 %s796_s6, 4  ;;  %s605_s4 = scalar_lea.hbm %s842_s2, 48  ;;  %s316_s12 = int_to_ptr.vmem [resolvable:$true] %s315_s12 }
  0x2b   : > { %519 = vpow2.f32 %v438_v5  ;;  %301 = vst [vmem:[%s796_s6 + $0x10] sm:$0xff] %v290_v6  ;;  %s314_s16 = scalar_lea.hbm %s842_s2, %s445_s21 }
  0x2c   : > { %s317_s18 = sshll.u32 %s314_s16, 4  ;;  %s318_s18 = int_to_ptr.hbm [resolvable:$true] %s317_s18 }
  0x2d   : > { %s599_s28 = sshra.s32 %s318_s18, 4  ;;  %s600_s28 = int_to_ptr.hbm [resolvable:$true] %s599_s28 }
  0x2e   : > { %s601_s19 = scalar_lea.hbm %s600_s28, 24  ;;  %p606_p7 = scmp.lt.s32.totalorder %s600_s28, %s842_s2 }
  0x2f   : > { %p602_p4 = scmp.ne.s32.totalorder %s600_s28, %s601_s19  ;;  %p607_p8 = scmp.lt.s32.totalorder %s605_s4, %s601_s19 }
  0x30   : > { %v518_v7 = vpop.eup %517 }
  0x31   : > { %v520_v8 = vpop.eup %519  ;;  %v245_v9 = vadd.f32 1.0, %v518_v7  ;;  %p603_p5 = pnand %p602_p4, %p743_p9  ;;  %p608_p10 = por %p607_p8, %p606_p7 }
  0x32   : > { %v246_v10 = vadd.f32 1.0, %v520_v8 }
  0x33   : > { %521 = vrcp.f32 %v245_v9  ;;  %vm252_vm0 = vweird.f32 %v245_v9  ;;  %v258_v14 = vand.u32 2147483648, %v245_v9  ;;  %v256_v17 = vand.u32 2147483647, %v245_v9  ;;  %p604_p6 = pneg %p603_p5 }
  0x34   : > { %523 = vrcp.f32 %v246_v10  ;;  %v273_v18 = vand.u32 2147483648, %v246_v10  ;;  %vm267_vm2 = vweird.f32 %v246_v10  ;;  %v271_v20 = vand.u32 2147483647, %v246_v10 }
  0x35   : > { %v259_v22 = vor.u32 1.1754944e-38, %v258_v14  ;;  %vm257_vm5 = vcmp.eq.f32.partialorder %v256_v17, 8.507059e+37  ;;  %p609_p13 = pnand %p608_p10, %p604_p6 }
  0x36   : > { %v274_v25 = vor.u32 1.1754944e-38, %v273_v18  ;;  %vm272_vm7 = vcmp.eq.f32.partialorder %v271_v20, 8.507059e+37 }
  0x39   : > { %v522_v11 = vpop.eup %521 }
  0x3a   : > { %v524_v12 = vpop.eup %523  ;;  %v248_v13 = vmul.f32 %v522_v11, %v245_v9  ;;  %vm253_vm1 = vweird.f32 %v522_v11 }
  0x3b   : > { %v263_v15 = vmul.f32 %v524_v12, %v246_v10  ;;  %vm268_vm3 = vweird.f32 %v524_v12  ;;  %vm254_vm4 = vmor %vm252_vm0, %vm253_vm1 }
  0x3c   : > { %v249_v16 = vsub.f32 1.0, %v248_v13  ;;  %vm269_vm6 = vmor %vm267_vm2, %vm268_vm3 }
  0x3d   : > { %v264_v19 = vsub.f32 1.0, %v263_v15 }
  0x3e   : > { %v250_v21 = vmul.f32 %v522_v11, %v249_v16 }
  0x3f   : > { %v265_v23 = vmul.f32 %v524_v12, %v264_v19 }
  0x40   : > { %v251_v24 = vadd.f32 %v522_v11, %v250_v21 }
  0x41   : > { %v266_v26 = vadd.f32 %v524_v12, %v265_v23 }
  0x42   : > { %v255_v27 = vsel %vm254_vm4, %v522_v11, %v251_v24 }
  0x43   : > { %v260_v28 = vsel %vm257_vm5, %v259_v22, %v255_v27  ;;  %v270_v29 = vsel %vm269_vm6, %v524_v12, %v266_v26 }
  0x44   : > { %v275_v30 = vsel %vm272_vm7, %v274_v25, %v270_v29  ;;  %v278_v31 = vmul.f32 %v260_v28, %v237_v2 }
  0x45   : > { %v279_v32 = vmul.f32 %v275_v30, %v238_v3  ;;  %v285_v33 = vadd.f32 %v275_v30, %v260_v28 }
  0x47   : > { %v280_v34 = vadd.f32 %v279_v32, %v278_v31  ;;  %300 = vst [vmem:[%s796_s6 + $0x8] sm:$0xff] %v285_v33 }
  0x49   : > { %299 = vst [vmem:[%s796_s6] sm:$0xff] %v280_v34 }
  0x4a   : > { %612 = shalt.err (!%p609_p13)
}
  0x4b   : > { %s675_s3 = smov 128   ;;  %s676_s25 = smov 8  }
  0x4c   : > { %450 = dma.vmem_to_hbm [thread:$0]  (%p743_p9), %s316_s12, 384, %s318_s18, %s303_s20, %s675_s3, %s675_s3, %s676_s25  }
  0x4d PF: > { %s332_s26 = sand.u32 1, %s651_s9   ;;  %p460_p0 = pnand %p427_p12, %p750_p11 }
  0x4e   : > { %s333_s27 = scalar_lea.sflag [#allocation5], %s332_s26 }
  0x4f   : > { %p461_p1 = pneg %p460_p0 }
  0x51   : > { %646 = dma.done.wait (%p461_p1), %s333_s27, 384  }
  0x52   : > { %648 = vsyncadd (%p461_p1), %s333_s27, 4294966912  ;;  %s21_s14 = sadd.s32 1, %s671_s14   ;;  %s848_s9 = smov %s655_s10 }
  0x53   : > { %p18_p2 = scmp.ge.s32.totalorder %s21_s14, 4   ;;  %s849_s10 = smov %s659_s11 }
  0x54   : > { %s850_s11 = smov %s748_s23  ;;  %s851_s12 = smov %s667_s13 }
  0x55   : > { %s852_s13 = smov %s854_s17  ;;  %20 = sbr.rel (!%p18_p2) target bundleno = 8 (0x8), region = 96 }
  0x5a   :  { %339 = vsyncpa [#allocation4], 1 }
  0x5b   :  { %341 = vsyncpa [#allocation4 + $0x1], 1 }
  0x5c   :  { %342 = vsyncpa [#allocation7], 1 }
  0x5d   :  { %344 = vsyncpa [#allocation7 + $0x1], 1 }
  0x5e   :  { %345 = vsyncpa [#allocation5], 1 }
  0x5f   :  { %347 = vsyncpa [#allocation5 + $0x1], 1 }

</bundles_post_ra>
